<compile_context>
chip_gen: v7x
topology: tpu7x:2x2x1
jax: 0.10.0
libtpu: 0.0.40
codegen_flags: <defaults>
</compile_context>

<pallas_src>
import jax
import jax.numpy as jnp
from jax import lax
from jax.experimental import pallas as pl
from jax.experimental.pallas import tpu as pltpu

SCALE = 1
BLOCK_SIZE = 8 * SCALE              # T
EMBED_DIM = 32 * SCALE              # E
NUM_HEADS = 4
HEAD_SIZE = EMBED_DIM // NUM_HEADS  # num_heads * head_size == embed_dim


def _mha_kernel(x_ref, wk_ref, wq_ref, wv_ref, wph_ref, bias_ref, o_ref):
    # Grid: (b, h).  Per step:
    #   x_ref:    (T, E)    current batch element (leading dim squeezed)
    #   wk/wq/wv: (E, hs)   this head's weights (wq already scaled by E**-0.5)
    #   wph_ref:  (hs, E)   this head's slice of the projection weight
    #   bias_ref: (1, E)
    #   o_ref:    (T, E)    resident across the h axis (accumulator)
    h = pl.program_id(1)

    x = x_ref[...]                                                    # (T, E)
    k = jnp.dot(x, wk_ref[...], preferred_element_type=jnp.float32)   # (T, hs)
    q = jnp.dot(x, wq_ref[...], preferred_element_type=jnp.float32)   # (T, hs), scale folded in
    v = jnp.dot(x, wv_ref[...], preferred_element_type=jnp.float32)   # (T, hs)

    # scores = k @ q^T (module does k @ q.transpose(1,2)); contract last dims,
    # no explicit transpose needed.
    s = lax.dot_general(k, q, (((1,), (1,)), ((), ())),
                        preferred_element_type=jnp.float32)            # (T, T)

    # Causal tril mask (module: masked_fill(triangle == 0, -inf)).
    T = s.shape[0]
    row = lax.broadcasted_iota(jnp.int32, (T, T), 0)
    col = lax.broadcasted_iota(jnp.int32, (T, T), 1)
    s = jnp.where(col <= row, s, jnp.float32(-1e30))  # large finite: no NaN risk in f32

    # softmax over the last dim (dim=2 in the module)
    s = s - jnp.max(s, axis=-1, keepdims=True)
    p = jnp.exp(s)
    p = p * pl.reciprocal(jnp.sum(p, axis=-1, keepdims=True), approx=True)

    out_h = jnp.dot(p, v, preferred_element_type=jnp.float32)          # (T, hs)

    # This head's projection contribution: cat(heads) @ Wp == sum_h out_h @ Wp_h.
    contrib = jnp.dot(out_h, wph_ref[...],
                      preferred_element_type=jnp.float32)              # (T, E)

    @pl.when(h == 0)
    def _init():
        o_ref[...] = jnp.broadcast_to(bias_ref[...], o_ref.shape).astype(o_ref.dtype)

    o_ref[...] += contrib.astype(o_ref.dtype)


def multi_head_layer(x, wk, wq, wv, wp, bp):
    """x: (B, T, E) f32; wk/wq/wv: (H, E, hs); wp: (E, E); bp: (E,)."""
    B, T, E = x.shape
    H, _, hs = wk.shape

    # Wrapper-side (one-time) weight prep: fold channels**-0.5 into Wq, split
    # the projection weight per head along the leading axis, make bias 2-D.
    wq_scaled = wq * jnp.float32(E ** (-0.5))
    wp_h = wp.reshape(H, hs, E)
    bp2 = bp.reshape(1, E)

    return pl.pallas_call(
        _mha_kernel,
        out_shape=jax.ShapeDtypeStruct((B, T, E), jnp.float32),
        grid_spec=pltpu.PrefetchScalarGridSpec(
            num_scalar_prefetch=0,
            grid=(B, H),                                   # head axis innermost (reduction)
            in_specs=[
                pl.BlockSpec((None, T, E), lambda b, h: (b, 0, 0)),    # x (per batch)
                pl.BlockSpec((None, E, hs), lambda b, h: (h, 0, 0)),   # Wk (per head, leading-axis)
                pl.BlockSpec((None, E, hs), lambda b, h: (h, 0, 0)),   # Wq (scaled)
                pl.BlockSpec((None, E, hs), lambda b, h: (h, 0, 0)),   # Wv
                pl.BlockSpec((None, hs, E), lambda b, h: (h, 0, 0)),   # Wp slice (per head)
                pl.BlockSpec((1, E), lambda b, h: (0, 0)),             # bias
            ],
            out_specs=pl.BlockSpec((None, T, E), lambda b, h: (b, 0, 0)),  # accumulated over h
        ),
        compiler_params=pltpu.CompilerParams(
            # batch blocks are independent -> parallel (megacore on v7x);
            # head axis accumulates into the output block -> arbitrary.
            dimension_semantics=("parallel", "arbitrary")),
    )(x, wk, wq_scaled, wv, wp_h, bp2)


def _reference(x, wk, wq, wv, wp, bp):
    """Plain-JAX mirror of the PyTorch forward (eval mode) for validation."""
    B, T, E = x.shape
    H = wk.shape[0]
    tri = jnp.tril(jnp.ones((T, T), jnp.float32))
    outs = []
    for h in range(H):
        k = x @ wk[h]
        q = x @ wq[h]
        v = x @ wv[h]
        s = (k @ jnp.swapaxes(q, 1, 2)) * (E ** -0.5)
        s = jnp.where(tri == 0, -jnp.inf, s)
        p = jax.nn.softmax(s, axis=2)
        outs.append(p @ v)
    cat = jnp.concatenate(outs, axis=-1)
    return cat @ wp + bp


if __name__ == "__main__":
    key = jax.random.PRNGKey(0)
    kx, kk, kq, kv, kp, kb = jax.random.split(key, 6)

    B, T, E, H, hs = 2, BLOCK_SIZE, EMBED_DIM, NUM_HEADS, HEAD_SIZE

    x = jax.random.normal(kx, (B, T, E), dtype=jnp.float32)
    # Per-head Linear(embed_dim, head_size, bias=False) weights stored as (E, hs)
    # so k = x @ W (equivalent to PyTorch's x @ W_lin.T).
    wk = jax.random.normal(kk, (H, E, hs), dtype=jnp.float32) * 0.1
    wq = jax.random.normal(kq, (H, E, hs), dtype=jnp.float32) * 0.1
    wv = jax.random.normal(kv, (H, E, hs), dtype=jnp.float32) * 0.1
    # projection: Linear(embed_dim, embed_dim) with bias, stored transposed.
    wp = jax.random.normal(kp, (E, E), dtype=jnp.float32) * 0.1
    bp = jax.random.normal(kb, (E,), dtype=jnp.float32) * 0.1

    out = multi_head_layer(x, wk, wq, wv, wp, bp)
    out = jax.block_until_ready(out)

    ref = _reference(x, wk, wq, wv, wp, bp)
    assert out.shape == (B, T, E)
    # tolerance relaxed slightly vs exact softmax because the kernel normalizes
    # with the EUP approximate reciprocal (pl.reciprocal(approx=True)).
    assert jnp.allclose(out, ref, atol=2e-3, rtol=2e-3), "mismatch vs reference"

    print("KERNEL_OK")
</pallas_src>

<mosaic_0001>
module attributes {stable_mosaic.version = 11 : i64} {
  func.func @_mha_kernel(%arg0: i32, %arg1: i32, %arg2: memref<1x8x32xf32, #tpu.memory_space<vmem>>, %arg3: memref<1x32x8xf32, #tpu.memory_space<vmem>>, %arg4: memref<1x32x8xf32, #tpu.memory_space<vmem>>, %arg5: memref<1x32x8xf32, #tpu.memory_space<vmem>>, %arg6: memref<1x8x32xf32, #tpu.memory_space<vmem>>, %arg7: memref<1x32xf32, #tpu.memory_space<vmem>>, %arg8: memref<1x8x32xf32, #tpu.memory_space<vmem>>) attributes {dimension_semantics = [#tpu.dimension_semantics<parallel>, #tpu.dimension_semantics<arbitrary>], iteration_bounds = array<i64: 2, 4>, scalar_prefetch = 0 : i64, scratch_operands = 0 : i64, tpu.core_type = #tpu.core_type<tc>, window_params = [{transform_indices = @transform_0, window_bounds = array<i64: 1, 8, 32>}, {transform_indices = @transform_1, window_bounds = array<i64: 1, 32, 8>}, {transform_indices = @transform_2, window_bounds = array<i64: 1, 32, 8>}, {transform_indices = @transform_3, window_bounds = array<i64: 1, 32, 8>}, {transform_indices = @transform_4, window_bounds = array<i64: 1, 8, 32>}, {pipeline_mode = #tpu.pipeline_mode<synchronous>, transform_indices = @transform_5, window_bounds = array<i64: 1, 32>}, {transform_indices = @transform_6, window_bounds = array<i64: 1, 8, 32>}]} {
    %c0 = arith.constant 0 : index
    %c0_0 = arith.constant 0 : index
    %c0_1 = arith.constant 0 : index
    %0 = vector.load %arg2[%c0, %c0_0, %c0_1] : memref<1x8x32xf32, #tpu.memory_space<vmem>>, vector<1x8x32xf32>
    %1 = vector.shape_cast %0 : vector<1x8x32xf32> to vector<8x32xf32>
    %c0_2 = arith.constant 0 : index
    %c0_3 = arith.constant 0 : index
    %c0_4 = arith.constant 0 : index
    %2 = vector.load %arg3[%c0_2, %c0_3, %c0_4] : memref<1x32x8xf32, #tpu.memory_space<vmem>>, vector<1x32x8xf32>
    %3 = vector.shape_cast %2 : vector<1x32x8xf32> to vector<32x8xf32>
    %cst = arith.constant dense<0.000000e+00> : vector<8x8xf32>
    %4 = tpu.matmul %1, %3, %cst {dimension_numbers = #tpu.dot_dimension_numbers<[1], [0], [0], [1], [0, 0, 1, 1], [], []>} : vector<8x32xf32>, vector<32x8xf32>, vector<8x8xf32> -> vector<8x8xf32>
    %c0_5 = arith.constant 0 : index
    %c0_6 = arith.constant 0 : index
    %c0_7 = arith.constant 0 : index
    %5 = vector.load %arg4[%c0_5, %c0_6, %c0_7] : memref<1x32x8xf32, #tpu.memory_space<vmem>>, vector<1x32x8xf32>
    %6 = vector.shape_cast %5 : vector<1x32x8xf32> to vector<32x8xf32>
    %cst_8 = arith.constant dense<0.000000e+00> : vector<8x8xf32>
    %7 = tpu.matmul %1, %6, %cst_8 {dimension_numbers = #tpu.dot_dimension_numbers<[1], [0], [0], [1], [0, 0, 1, 1], [], []>} : vector<8x32xf32>, vector<32x8xf32>, vector<8x8xf32> -> vector<8x8xf32>
    %c0_9 = arith.constant 0 : index
    %c0_10 = arith.constant 0 : index
    %c0_11 = arith.constant 0 : index
    %8 = vector.load %arg5[%c0_9, %c0_10, %c0_11] : memref<1x32x8xf32, #tpu.memory_space<vmem>>, vector<1x32x8xf32>
    %9 = vector.shape_cast %8 : vector<1x32x8xf32> to vector<32x8xf32>
    %cst_12 = arith.constant dense<0.000000e+00> : vector<8x8xf32>
    %10 = tpu.matmul %1, %9, %cst_12 {dimension_numbers = #tpu.dot_dimension_numbers<[1], [0], [0], [1], [0, 0, 1, 1], [], []>} : vector<8x32xf32>, vector<32x8xf32>, vector<8x8xf32> -> vector<8x8xf32>
    %cst_13 = arith.constant dense<0.000000e+00> : vector<8x8xf32>
    %11 = tpu.matmul %4, %7, %cst_13 {dimension_numbers = #tpu.dot_dimension_numbers<[1], [1], [0], [0], [0, 0, 1, 0], [], []>} : vector<8x8xf32>, vector<8x8xf32>, vector<8x8xf32> -> vector<8x8xf32>
    %12 = tpu.iota {dimensions = array<i32: 0>} : vector<8x8xi32>
    %13 = tpu.iota {dimensions = array<i32: 1>} : vector<8x8xi32>
    %14 = arith.cmpi sle, %13, %12 : vector<8x8xi32>
    %cst_14 = arith.constant -1.000000e+30 : f32
    %15 = vector.broadcast %cst_14 : f32 to vector<8x8xf32>
    %16 = arith.select %14, %11, %15 : vector<8x8xi1>, vector<8x8xf32>
    %cst_15 = arith.constant dense<0xFF800000> : vector<8xf32>
    %17 = vector.multi_reduction <maximumf>, %16, %cst_15 [1] : vector<8x8xf32> to vector<8xf32>
    %18 = vector.shape_cast %17 : vector<8xf32> to vector<8x1xf32>
    %19 = vector.broadcast %18 : vector<8x1xf32> to vector<8x8xf32>
    %20 = arith.subf %16, %19 : vector<8x8xf32>
    %21 = math.exp %20 : vector<8x8xf32>
    %cst_16 = arith.constant dense<0.000000e+00> : vector<8xf32>
    %22 = vector.multi_reduction <add>, %21, %cst_16 [1] : vector<8x8xf32> to vector<8xf32>
    %23 = vector.shape_cast %22 : vector<8xf32> to vector<8x1xf32>
    %24 = tpu.reciprocal %23 {approx = true} : vector<8x1xf32> -> vector<8x1xf32>
    %25 = vector.broadcast %24 : vector<8x1xf32> to vector<8x8xf32>
    %26 = arith.mulf %21, %25 : vector<8x8xf32>
    %cst_17 = arith.constant dense<0.000000e+00> : vector<8x8xf32>
    %27 = tpu.matmul %26, %10, %cst_17 {dimension_numbers = #tpu.dot_dimension_numbers<[1], [0], [0], [1], [0, 0, 1, 1], [], []>} : vector<8x8xf32>, vector<8x8xf32>, vector<8x8xf32> -> vector<8x8xf32>
    %c0_18 = arith.constant 0 : index
    %c0_19 = arith.constant 0 : index
    %c0_20 = arith.constant 0 : index
    %28 = vector.load %arg6[%c0_18, %c0_19, %c0_20] : memref<1x8x32xf32, #tpu.memory_space<vmem>>, vector<1x8x32xf32>
    %29 = vector.shape_cast %28 : vector<1x8x32xf32> to vector<8x32xf32>
    %cst_21 = arith.constant dense<0.000000e+00> : vector<8x32xf32>
    %30 = tpu.matmul %27, %29, %cst_21 {dimension_numbers = #tpu.dot_dimension_numbers<[1], [0], [0], [1], [0, 0, 1, 1], [], []>} : vector<8x8xf32>, vector<8x32xf32>, vector<8x32xf32> -> vector<8x32xf32>
    %c0_i32 = arith.constant 0 : i32
    %31 = arith.cmpi eq, %arg1, %c0_i32 : i32
    %32 = arith.extui %31 : i1 to i32
    %c0_i32_22 = arith.constant 0 : i32
    %33 = arith.cmpi ne, %32, %c0_i32_22 : i32
    scf.if %33 {
      %c0_29 = arith.constant 0 : index
      %c0_30 = arith.constant 0 : index
      %40 = vector.load %arg7[%c0_29, %c0_30] : memref<1x32xf32, #tpu.memory_space<vmem>>, vector<1x32xf32>
      %41 = vector.shape_cast %40 : vector<1x32xf32> to vector<1x32xf32>
      %42 = vector.broadcast %41 : vector<1x32xf32> to vector<8x32xf32>
      %c0_31 = arith.constant 0 : index
      %c0_32 = arith.constant 0 : index
      %c0_33 = arith.constant 0 : index
      %43 = vector.load %arg8[%c0_31, %c0_32, %c0_33] : memref<1x8x32xf32, #tpu.memory_space<vmem>>, vector<1x8x32xf32>
      %44 = vector.shape_cast %43 : vector<1x8x32xf32> to vector<8x32xf32>
      %45 = vector.shape_cast %42 : vector<8x32xf32> to vector<1x8x32xf32>
      tpu.vector_store %arg8[%c0_31, %c0_32, %c0_33], %45 {strides = array<i32>} : memref<1x8x32xf32, #tpu.memory_space<vmem>>, vector<1x8x32xf32>,
    } else {
    }
    %c0_23 = arith.constant 0 : index
    %c0_24 = arith.constant 0 : index
    %c0_25 = arith.constant 0 : index
    %34 = vector.load %arg8[%c0_23, %c0_24, %c0_25] : memref<1x8x32xf32, #tpu.memory_space<vmem>>, vector<1x8x32xf32>
    %35 = vector.shape_cast %34 : vector<1x8x32xf32> to vector<8x32xf32>
    %36 = arith.addf %35, %30 : vector<8x32xf32>
    %c0_26 = arith.constant 0 : index
    %c0_27 = arith.constant 0 : index
    %c0_28 = arith.constant 0 : index
    %37 = vector.load %arg8[%c0_26, %c0_27, %c0_28] : memref<1x8x32xf32, #tpu.memory_space<vmem>>, vector<1x8x32xf32>
    %38 = vector.shape_cast %37 : vector<1x8x32xf32> to vector<8x32xf32>
    %39 = vector.shape_cast %36 : vector<8x32xf32> to vector<1x8x32xf32>
    tpu.vector_store %arg8[%c0_26, %c0_27, %c0_28], %39 {strides = array<i32>} : memref<1x8x32xf32, #tpu.memory_space<vmem>>, vector<1x8x32xf32>,
    return
  }
  func.func @transform_0(%arg0: i32, %arg1: i32) -> (i32, i32, i32) {
    %c0_i32 = arith.constant 0 : i32
    %c0_i32_0 = arith.constant 0 : i32
    %c0_i32_1 = arith.constant 0 : i32
    return %arg0, %c0_i32, %c0_i32_0 : i32, i32, i32
  }
  func.func @transform_1(%arg0: i32, %arg1: i32) -> (i32, i32, i32) {
    %c0_i32 = arith.constant 0 : i32
    %c0_i32_0 = arith.constant 0 : i32
    %c0_i32_1 = arith.constant 0 : i32
    return %arg1, %c0_i32, %c0_i32_0 : i32, i32, i32
  }
  func.func @transform_2(%arg0: i32, %arg1: i32) -> (i32, i32, i32) {
    %c0_i32 = arith.constant 0 : i32
    %c0_i32_0 = arith.constant 0 : i32
    %c0_i32_1 = arith.constant 0 : i32
    return %arg1, %c0_i32, %c0_i32_0 : i32, i32, i32
  }
  func.func @transform_3(%arg0: i32, %arg1: i32) -> (i32, i32, i32) {
    %c0_i32 = arith.constant 0 : i32
    %c0_i32_0 = arith.constant 0 : i32
    %c0_i32_1 = arith.constant 0 : i32
    return %arg1, %c0_i32, %c0_i32_0 : i32, i32, i32
  }
  func.func @transform_4(%arg0: i32, %arg1: i32) -> (i32, i32, i32) {
    %c0_i32 = arith.constant 0 : i32
    %c0_i32_0 = arith.constant 0 : i32
    %c0_i32_1 = arith.constant 0 : i32
    return %arg1, %c0_i32, %c0_i32_0 : i32, i32, i32
  }
  func.func @transform_5(%arg0: i32, %arg1: i32) -> (i32, i32) {
    %c0_i32 = arith.constant 0 : i32
    %c0_i32_0 = arith.constant 0 : i32
    %c0_i32_1 = arith.constant 0 : i32
    return %c0_i32, %c0_i32_0 : i32, i32
  }
  func.func @transform_6(%arg0: i32, %arg1: i32) -> (i32, i32, i32) {
    %c0_i32 = arith.constant 0 : i32
    %c0_i32_0 = arith.constant 0 : i32
    %c0_i32_1 = arith.constant 0 : i32
    return %arg0, %c0_i32, %c0_i32_0 : i32, i32, i32
  }
}

</mosaic_0001>

<bundles_post_ra>
// kernel: tpu_custom_call.1
= control target key start
LH: loop header
LB: loop body
LE: loop exit
PB: predicated region body
PF: predicated region fallthrough
CT: control target
= control target key end

     0   :  { %11 = vsyncpa [#allocation3], 0  ;;  %s1464_s0 = inlined_call_operand.vmem [shape: f32[2,8,32], index: 0, kind: input, shape index: {}]   ;;  %s1465_s1 = inlined_call_operand.vmem [shape: f32[4,32,8], index: 1, kind: input, shape index: {}]   ;;  %s1466_s2 = inlined_call_operand.vmem [shape: f32[4,32,8], index: 2, kind: input, shape index: {}]   ;;  %s1467_s3 = inlined_call_operand.vmem [shape: f32[4,32,8], index: 3, kind: input, shape index: {}]   ;;  %s1468_s4 = inlined_call_operand.vmem [shape: f32[4,8,32], index: 4, kind: input, shape index: {}]   ;;  %s1469_s5 = inlined_call_operand.vmem [shape: f32[1,32], index: 5, kind: input, shape index: {}]   ;;  %s1470_s6 = inlined_call_operand.hbm [shape: f32[2,8,32], index: 6, kind: output, shape index: {}]  }
   0x1   :  { %13 = vsyncpa [#allocation3 + $0x1], 0  ;;  %s1281_s21 = smov 0   ;;  %s1283_s22 = smov 0  }
   0x2   :  { %s1285_s23 = smov 0   ;;  %s1287_s24 = smov 0  }
   0x3   :  { %s1289_s25 = smov 0   ;;  %s1291_s26 = smov 0  }
   0x4   :  { %s1293_s27 = smov 0   ;;  %s1295_s28 = smov 0  }
   0x5 LB: > { %s951_s29 = sadd.s32 4294967295, %s1240_s28   ;;  %s952_s30 = sadd.s32 4294967294, %s1240_s28   ;;  %s1240_s28 = sphi %s1295_s28, %s19_s28   ;;  %s1236_s27 = sphi %s1293_s27, %s1481_s27   ;;  %s1232_s26 = sphi %s1291_s26, %s1480_s26   ;;  %s1228_s25 = sphi %s1289_s25, %s1479_s25   ;;  %s1224_s24 = sphi %s1287_s24, %s1478_s24   ;;  %s1220_s23 = sphi %s1285_s23, %s1477_s23   ;;  %s1216_s22 = sphi %s1283_s22, %s1476_s22   ;;  %s1212_s21 = sphi %s1281_s21, %s1475_s21  }
   0x6   : > { %s28_s7 = sadd.s32 1, %s1232_s26  ;;  %s31_s8 = sadd.s32 1, %s1236_s27 }
   0x7   : > { %p29_p0 = scmp.ge.s32.totalorder %s28_s7, 4  ;;  %p199_p1 = scmp.ne.s32.totalorder %s1220_s23, %s1216_s22 }
   0x8   : > { %p200_p2 = scmp.eq.s32.totalorder %s951_s29, 7  ;;  %p205_p4 = scmp.ne.s32.totalorder %s1216_s22, %s1212_s21 }
   0x9   : > { %s1483_s7 = smov (%p29_p0, %s28_s7), 0  ;;  %s1485_s8 = smov (!%p29_p0, %s31_s8), %s1236_s27 }
   0xa   : > { %p1330_p3 = por %p200_p2, %p199_p1  ;;  %p33_p5 = scmp.ge.s32.totalorder %s1485_s8, 2 }
   0xb   : > { %p206_p6 = scmp.eq.s32.totalorder %s952_s30, 7  ;;  %p955_p7 = scmp.ge.s32.totalorder %s1240_s28, 1 }
   0xc   : > { %p265_p8 = scmp.lt.s32.totalorder %s1240_s28, 9  ;;  %s1487_s8 = smov (%p33_p5, %s1485_s8), 0 }
   0xd   : > { %p1340_p9 = por %p206_p6, %p205_p4  ;;  %s186_s11 = ssub.s32 %s1236_s27, %s1487_s8 }
   0xe   : > { %p266_p10 = pnand %p955_p7, %p265_p8  ;;  %s189_s12 = sadd.s32 1, %s1220_s23 }
   0xf   : > { %p187_p11 = scmp.eq.s32.totalorder %s186_s11, 0  ;;  %p317_p12 = scmp.lt.s32.totalorder (!%p266_p10), %s1224_s24, 3  ;;  %v1242_v0 = vmov (!%p266_p10), 0.0|0.0   ;;  %vm1243_vm0 = vmmov (!%p266_p10), 0   ;;  %v1244_v1 = vmov (!%p266_p10), 0.0   ;;  %vm341_vm1 = vcmask (!%p266_p10), 261120  }
  0x10   : > { %269 = sbr.rel (%p266_p10) target bundleno = 1229 (0x4cd), region = 44  ;;  %s1471_s14 = sand.u32 (!%p266_p10), 1, %s1216_s22   ;;  %1056 = vmatprep.subr.bf16.mxu1 (!%p266_p10), %v1242_v0  ;;  %1050 = vmatprep.subr.bf16.mxu0 (!%p266_p10), %v1242_v0  ;;  %vm563_vm2 = vcmask (!%p266_p10), 64512   ;;  %v640_v25 = vlaneseq (!%p266_p10) }
  0x11   : > { %s1348_s13 = scalar_select %p187_p11, %s1220_s23, %s189_s12  }
  0x12   : > { %s1354_s15 = sshll.u32 (!%p266_p10), %s1471_s14, 3  ;;  %1021 = vmatprep.mubr.msk.f32.mxu1 (!%p266_p10), %vm1243_vm0, %v1244_v1  ;;  %1010 = vmatprep.mubr.msk.f32.mxu0 (!%p266_p10), %vm1243_vm0, %v1244_v1  ;;  %p313_p13 = scmp.lt.s32.totalorder (!%p266_p10), %s1228_s25, 1  ;;  %v641_v26 = vshrl.u32 (!%p266_p10), %v640_v25, 7  ;;  %v643_v27 = vand.u32 (!%p266_p10), 127, %v640_v25 }
  0x13   : > { %s312_s19 = scalar_lea.vmem (!%p266_p10), [#allocation2], %s1354_s15  ;;  %p972_p0 = scmp.ne.s32.totalorder (!%p266_p10), %s1224_s24, 0 }
  0x14   : > { %vm644_vm3 = vcmp.le.s32.totalorder (!%p266_p10), %v643_v27, %v641_v26 }
  0x17   : > { %s1357_s16 = scalar_select %p317_p12, %s1224_s24, 3 }
  0x18   : > { %s314_s12 = scalar_select %p313_p13, %s1228_s25, 1 }
  0x19   : > { %s1363_s17 = sshll.u32 %s1357_s16, 5  ;;  %v973_v47 = vld [vmem:[%s1469_s5] ss:$0 sm:$0xff] (!%p972_p0) }
  0x1a   : > { %s326_s20 = scalar_lea.vmem %s1466_s2, %s1363_s17  ;;  %s321_s11 = scalar_lea.vmem %s1465_s1, %s1363_s17  ;;  %815 = vst.msk [vmem:[%s312_s19] sm:$0xff] (!%p972_p0), %vm341_vm1, %v973_v47 }
  0x1b   : > { %v415_v2 = vld [vmem:[%s326_s20] sm:$0xff]  ;;  %v416_v3 = vld [vmem:[%s326_s20 + $0x8] sm:$0xff]  ;;  %v417_v4 = vld [vmem:[%s326_s20 + $0x10] sm:$0xff]  ;;  %s957_s18 = sshll.u32 %s314_s12, 3  ;;  %s331_s30 = scalar_lea.vmem %s1467_s3, %s1363_s17 }
  0x1c   : > { %v1057_v5 = vpack.c.bf16 %v416_v3, %v415_v2  ;;  %v337_v6 = vld [vmem:[%s321_s11] sm:$0xff]  ;;  %v338_v7 = vld [vmem:[%s321_s11 + $0x8] sm:$0xff]  ;;  %v418_v8 = vld [vmem:[%s326_s20 + $0x18] sm:$0xff]  ;;  %s316_s29 = scalar_lea.vmem %s1464_s0, %s957_s18  ;;  %s964_s17 = sshll.u32 %s1357_s16, 3 }
  0x1d   : > { %v1051_v9 = vpack.c.bf16 %v338_v7, %v337_v6  ;;  %v339_v10 = vld [vmem:[%s321_s11 + $0x10] sm:$0xff]  ;;  %v340_v11 = vld [vmem:[%s321_s11 + $0x18] sm:$0xff]  ;;  %v1060_v12 = vpack.c.bf16 %v418_v8, %v417_v4  ;;  %v336_v14 = vld [vmem:[%s316_s29] sm:$0xff]  ;;  %s335_s18 = scalar_lea.vmem %s1468_s4, %s964_s17 }
  0x1e   : > { %1058 = vmatpush3.bf16.msra.mxu1 %v1057_v5  ;;  %v1054_v13 = vpack.c.bf16 %v340_v11, %v339_v10  ;;  %v489_v19 = vld [vmem:[%s331_s30] sm:$0xff]  ;;  %v490_v20 = vld [vmem:[%s331_s30 + $0x8] sm:$0xff]  ;;  %v491_v21 = vld [vmem:[%s331_s30 + $0x10] sm:$0xff] }
  0x1f   : > { %1052 = vmatpush3.bf16.msra.mxu0 %v1051_v9  ;;  %1059 = vmatprep.subr.bf16.mxu1 %v1242_v0  ;;  %v1063_v22 = vpack.c.bf16 %v490_v20, %v489_v19  ;;  %v492_v23 = vld [vmem:[%s331_s30 + $0x18] sm:$0xff]  ;;  %v730_v39 = vld [vmem:[%s335_s18] sm:$0xff] }
  0x20   : > { %1053 = vmatprep.subr.bf16.mxu0 %v1242_v0  ;;  %v1066_v24 = vpack.c.bf16 %v492_v23, %v491_v21 }
  0x22   : > { %1061 = vmatpush3.bf16.msra.mxu1 %v1060_v12 }
  0x23   : > { %1055 = vmatpush3.bf16.msra.mxu0 %v1054_v13  ;;  %1035 = vmatprep.subr.mxu1 %v1244_v1 }
  0x24   : > { %1062 = vmatprep.subr.bf16.mxu0 %v1242_v0 }
  0x25   : > { %1022 = vmatmul.mubr.msk.f32.vlgmr.msra.gmra.mrb[0].mxu1 %vm341_vm1, %v336_v14 }
  0x26   : > { %1011 = vmatmul.mubr.msk.f32.vlgmr.msra.gmra.mrb[0].mxu0 %vm341_vm1, %v336_v14  ;;  %1037 = vmatprep.mubr.msk.f32.mxu1 %vm1243_vm0, %v1244_v1 }
  0x27   : > { %1032 = vmatprep.mubr.msk.f32.mxu0 %vm1243_vm0, %v1244_v1  ;;  %1064 = vmatpush3.bf16.msra.mxu0 %v1063_v22 }
  0x28   : > { %1065 = vmatprep.subr.bf16.mxu0 %v1242_v0 }
  0x2b   : > { %1067 = vmatpush3.bf16.msra.mxu0 %v1066_v24 }
  0x2c   : > { %1045 = vmatprep.subr.mxu0 %v1244_v1 }
  0x2e   : > { %1033 = vmatmul.mubr.msk.f32.vlgmr.msra.gmra.mrb[2].mxu0 %vm341_vm1, %v336_v14 }
  0x2f   : > { %1047 = vmatprep.mubr.msk.f32.mxu0 %vm1243_vm0, %v1244_v1  ;;  %1046 = vmatpush3.msra.mxu0 %v730_v39 }
  0xf8   : > { %v485_v15 = vpop.f32.mrb[0].mxu1 }
  0xf9   : > { %v1023_v16 = vpop.f32.mrb[1].mxu1  ;;  %1036 = vmatpush3.xpose.msk.msra.mxu1 %vm563_vm2, %v485_v15  ;;  %v411_v17 = vpop.f32.mrb[0].mxu0 }
  0xfa   : > { %v1012_v18 = vpop.f32.mrb[1].mxu0  ;;  %1040 = vmatprep.subr.mxu1 %v1244_v1 }
  0xfc   : > { %1038 = vmatmul.mubr.msk.f32.vlgmr.msra.gmra.mrb[2].mxu1 %vm563_vm2, %v411_v17 }
  0xfd   : > { %1042 = vmatprep.mubr.msk.f32.mxu1 %vm1243_vm0, %v1244_v1 }
 0x101   : > { %v559_v37 = vpop.f32.mrb[2].mxu0 }
 0x102   : > { %v1034_v38 = vpop.f32.mrb[3].mxu0  ;;  %1041 = vmatpush3.msra.mxu1 %v559_v37 }
 0x1cf   : > { %v636_v28 = vpop.f32.mrb[2].mxu1 }
 0x1d0   : > { %v645_v29 = vsel %vm644_vm3, %v636_v28, -1e+30  ;;  %v1039_v30 = vpop.f32.mrb[3].mxu1 }
 0x1d1   : > { %v646_v31 = vsel %vm563_vm2, %v645_v29, -inf }
 0x1d2   : > { %647 = vmax.xlane.f32.xlu0 %v646_v31 }
 0x25f   : > { %v648_v32 = vpop.xlane.xlu0 %647 }
 0x260   : > { %v649_v33 = vsub.f32 %v645_v29, %v648_v32 }
 0x262   : > { %v650_v34 = vmul.f32 1.442695, %v649_v33 }
 0x264   : > { %1142 = vpow2.f32 %v650_v34 }
 0x26e   : > { %v1143_v35 = vpop.eup %1142 }
 0x26f   : > { %v652_v36 = vsel %vm563_vm2, %v1143_v35, 0.0 }
 0x270   : > { %653 = vadd.xlane.f32.xlu0 %v652_v36 }
 0x2fd   : > { %v654_v40 = vpop.xlane.xlu0 %653 }
 0x2fe   : > { %1144 = vrcp.f32 %v654_v40 }
 0x308   : > { %v1145_v41 = vpop.eup %1144 }
 0x309   : > { %v656_v42 = vmul.f32 %v1145_v41, %v1143_v35 }
 0x30b   : > { %1043 = vmatmul.mubr.msk.f32.vlgmr.msra.gmra.mrb[4].mxu1 %vm563_vm2, %v656_v42 }
 0x3de   : > { %v726_v43 = vpop.f32.mrb[4].mxu1 }
 0x3df   : > { %v1044_v44 = vpop.f32.mrb[5].mxu1  ;;  %1048 = vmatmul.mubr.msk.f32.vlgmr.msra.gmra.mrb[4].mxu0 %vm563_vm2, %v726_v43 }
 0x4ad   : > { %807 = sbr.rel (%p972_p0) target bundleno = 1204 (0x4b4), region = 48 }
 0x4b2   : > { %v800_v45 = vpop.f32.mrb[4].mxu0 }
 0x4b3   : > { %v1049_v46 = vpop.f32.mrb[5].mxu0 }
 0x4b4 PF: > { %v816_v48 = vld [vmem:[%s312_s19] sm:$0xff]  ;;  %s975_s14 = sshll.u32 %s1228_s25, 7  ;;  %s833_s24 = sshll.u32 %s312_s19, 4  ;;  %s1410_s24 = int_to_ptr.vmem [resolvable:$true] %s833_s24 }
 0x4b5   : > { %v817_v49 = vadd.f32 %v816_v48, %v800_v45  ;;  %s1408_s15 = scalar_lea.hbm %s1470_s6, %s975_s14  ;;  %s1474_s17 = sand.u32 1, %s1216_s22  }
 0x4b6   : > { %s820_s11 = scalar_lea.sflag [#allocation3], %s1474_s17  ;;  %s1146_s12 = scalar_lea.vmem %s1410_s24, 128 }
 0x4b7   : > { %818 = vst.msk [vmem:[%s312_s19] sm:$0xff] %vm341_vm1, %v817_v49  ;;  %p1147_p1 = scmp.ne.s32.totalorder %s1410_s24, %s1146_s12  ;;  %s1245_s25 = smov [#allocation2]  }
 0x4b8   : > { %s1150_s18 = sshll.u32 %s1245_s25, 4  ;;  %s1151_s18 = int_to_ptr.vmem [resolvable:$false] %s1150_s18 }
 0x4b9   : > { %p1148_p2 = pnand %p1147_p1, %p1330_p3  ;;  %s1152_s16 = scalar_lea.vmem %s1151_s18, 256 }
 0x4ba   : > { %p1153_p5 = scmp.lt.s32.totalorder %s1410_s24, %s1151_s18  ;;  %p1154_p6 = scmp.lt.s32.totalorder %s1152_s16, %s1146_s12 }
 0x4bb   : > { %p1149_p4 = pneg %p1148_p2 }
 0x4bc   : > { %p1155_p7 = por %p1154_p6, %p1153_p5 }
 0x4be   : > { %p1156_p8 = pnand %p1155_p7, %p1149_p4 }
 0x4c0   : > { %1159 = shalt.err (!%p1156_p8)
}
 0x4c1   : > { %s1160_s19 = scalar_lea.hbm %s1408_s15, 128  ;;  %s1164_s20 = scalar_lea.hbm %s1470_s6, 256 }
 0x4c2   : > { %p1161_p10 = scmp.ne.s32.totalorder %s1408_s15, %s1160_s19  ;;  %p1165_p13 = scmp.lt.u32.totalorder %s1408_s15, %s1470_s6 }
 0x4c3   : > { %p1166_p0 = scmp.lt.u32.totalorder %s1164_s20, %s1160_s19  ;;  %p1168_p2 = scmp.lt.u32.totalorder %s1160_s19, %s1408_s15 }
 0x4c4   : > { %p1162_p11 = pnand %p1161_p10, %p1330_p3 }
 0x4c5   : > { %p1167_p1 = por %p1166_p0, %p1165_p13 }
 0x4c6   : > { %p1163_p12 = pneg %p1162_p11 }
 0x4c7   : > { %p1169_p4 = por %p1168_p2, %p1167_p1 }
 0x4c9   : > { %p1170_p5 = pnand %p1169_p4, %p1163_p12 }
 0x4cb   : > { %1173 = shalt.err (!%p1170_p5)
}
 0x4cc   : > { %1068 = dma.vmem_to_hbm [thread:$0]  (%p1330_p3), %s1410_s24, 128, %s1408_s15, %s820_s11  }
 0x4cd PF: > { %p1074_p6 = scmp.ge.s32.totalorder %s1240_s28, 2  ;;  %s845_s12 = sand.u32 1, %s1212_s21  }
 0x4ce   : > { %s846_s25 = scalar_lea.sflag [#allocation3], %s845_s12 }
 0x4cf   : > { %p1071_p7 = pnand %p1074_p6, %p1340_p9 }
 0x4d1   : > { %1207 = dma.done.wait (!%p1071_p7), %s846_s25, 128  }
 0x4d2   : > { %1209 = vsyncadd (!%p1071_p7), %s846_s25, 4294967168  ;;  %s19_s28 = sadd.s32 1, %s1240_s28   ;;  %s1475_s21 = smov %s1216_s22 }
 0x4d3   : > { %p16_p8 = scmp.ge.s32.totalorder %s19_s28, 10   ;;  %s1476_s22 = smov %s1220_s23 }
 0x4d4   : > { %s1477_s23 = smov %s1348_s13  ;;  %s1478_s24 = smov %s1232_s26 }
 0x4d5   : > { %s1479_s25 = smov %s1236_s27  ;;  %s1480_s26 = smov %s1483_s7 }
 0x4d6   : > { %s1481_s27 = smov %s1487_s8  ;;  %18 = sbr.rel (!%p16_p8) target bundleno = 5 (0x5), region = 95 }
 0x4dd   :  { %851 = vsyncpa [#allocation3], 1 }
 0x4de   :  { %853 = vsyncpa [#allocation3 + $0x1], 1 }

</bundles_post_ra>
